<compile_context>
chip_gen: v5e
topology: v5e:2x2
jax: 0.10.0
libtpu: 0.0.40
codegen_flags: <defaults>
</compile_context>

<pallas_src>
import jax
import jax.numpy as jnp
from jax.experimental import pallas as pl
from jax.experimental.pallas import tpu as pltpu

N_EMBD = 16
HIDDEN = 4 * N_EMBD  # 64


def _round_up(x, m):
    return ((x + m - 1) // m) * m


def ffn_kernel(x_ref, w1_ref, b1_ref, w2_ref, b2_ref, o_ref):
    # x_ref: (tile_p, Cp) in the *input* dtype (e.g. f32); cast to the MXU operand dtype
    # here so the wrapper never needs a separate HBM cast pass over x.
    x = x_ref[...].astype(w1_ref.dtype)
    h = jnp.dot(x, w1_ref[...], preferred_element_type=jnp.float32)
    h = jnp.maximum(h + b1_ref[...], 0.0)          # bias + ReLU in f32 (v5e-safe epilogue)
    h = h.astype(w2_ref.dtype)                     # back to MXU operand dtype
    o = jnp.dot(h, w2_ref[...], preferred_element_type=jnp.float32) + b2_ref[...]
    # Dropout(p=0.0) == identity -> nothing to do.
    o_ref[...] = o.astype(o_ref.dtype)


def pack_ffn_params(w1, b1, w2, b2, *, compute_dtype=jnp.bfloat16):
    """One-time parameter prep (hoisted out of the per-call path).

    With C = 16 a (M, 16) slab would force 16/128-lane masked loads/stores, so we fold
    pack = 128 // C = 8 consecutive rows into the 128-lane axis and turn the weights into
    block-diagonal kron(I_pack, W) matrices; both matmuls then run on lane-dense
    (rows/8, 128) slabs with unmasked vld/vst.
    """
    C, H = w1.shape
    pack = 128 // C if (C < 128 and 128 % C == 0) else 1
    eye = jnp.eye(pack, dtype=jnp.float32)
    w1p = jnp.kron(eye, w1.astype(jnp.float32)).astype(compute_dtype)   # (C*pack, H*pack)
    w2p = jnp.kron(eye, w2.astype(jnp.float32)).astype(compute_dtype)   # (H*pack, C*pack)
    b1p = jnp.tile(b1.astype(jnp.float32), pack).reshape(1, H * pack)   # f32 epilogue bias
    b2p = jnp.tile(b2.astype(jnp.float32), pack).reshape(1, C * pack)
    return {"w1p": w1p, "b1p": b1p, "w2p": w2p, "b2p": b2p,
            "pack": pack, "C": C, "H": H}


def feed_forward_packed(x, params, *, tile_rows=32768, out_dtype=None):
    """Fused Linear->ReLU->Linear->Dropout(0.) using pre-packed params.  x: (B, T, C)."""
    B, T, C = x.shape
    assert C == params["C"], "x feature dim does not match packed params"
    pack = params["pack"]
    w1p, b1p, w2p, b2p = params["w1p"], params["b1p"], params["w2p"], params["b2p"]
    Cp, Hp = w1p.shape
    out_dtype = x.dtype if out_dtype is None else out_dtype
    M = B * T

    SUB = 16                    # sublane rounding unit (valid for both f32 and bf16 blocks)
    unit = pack * SUB           # original-row granularity of one full-sublane packed tile
    M_pad = _round_up(M, unit)  # tiny, shape-static pad (< 128 rows); usually a no-op

    x2 = x.reshape(M, C)
    if M_pad != M:
        x2 = jnp.pad(x2, ((0, M_pad - M), (0, 0)))
    Mp = M_pad // pack                         # multiple of SUB
    xp = x2.reshape(Mp, Cp)                    # row-major repack: free, no cast, no copy pass

    # Row tiling in packed-row units: large tiles amortize the ~0.35us per-grid-step
    # overhead, but cap at ceil(Mp/2) so there are >= 2 "parallel" steps when possible
    # (keeps both v7x TensorCores busy).  Ragged last tile -> Pallas partial blocks.
    pref = max(((tile_rows // pack) // SUB) * SUB, SUB)
    half = _round_up(pl.cdiv(Mp, 2), SUB)
    tile_p = min(pref, half)
    n_tiles = pl.cdiv(Mp, tile_p)

    out_p = pl.pallas_call(
        ffn_kernel,
        out_shape=jax.ShapeDtypeStruct((Mp, Cp), out_dtype),
        grid=(n_tiles,),
        in_specs=[
            pl.BlockSpec((tile_p, Cp), lambda i: (i, 0)),   # packed activations (tiled rows)
            # Constant-index weight/bias blocks: Pallas skips re-DMA when the block index
            # does not change between steps, so these stay VMEM-resident (~0.5 MiB total).
            pl.BlockSpec((Cp, Hp), lambda i: (0, 0)),       # block-diag W1
            pl.BlockSpec((1, Hp), lambda i: (0, 0)),        # b1 (lane-dense, f32)
            pl.BlockSpec((Hp, Cp), lambda i: (0, 0)),       # block-diag W2
            pl.BlockSpec((1, Cp), lambda i: (0, 0)),        # b2 (lane-dense, f32)
        ],
        out_specs=pl.BlockSpec((tile_p, Cp), lambda i: (i, 0)),
        compiler_params=pltpu.CompilerParams(
            dimension_semantics=("parallel",),              # shards row tiles across TCs (v7x)
            vmem_limit_bytes=32 * 1024 * 1024,              # v7x-safe; default tiles ~9 MiB live
        ),
    )(xp, w1p, b1p, w2p, b2p)

    out2 = out_p.reshape(M_pad, C)[:M]
    return out2.reshape(B, T, C)


def feed_forward(x, w1, b1, w2, b2, *, tile_rows=32768,
                 compute_dtype=jnp.bfloat16, out_dtype=None):
    """Convenience wrapper (packs params per call; prefer pack_ffn_params once)."""
    params = pack_ffn_params(w1, b1, w2, b2, compute_dtype=compute_dtype)
    return feed_forward_packed(x, params, tile_rows=tile_rows, out_dtype=out_dtype)


def reference(x, w1, b1, w2, b2):
    h = jnp.maximum(x @ w1 + b1, 0.0)
    return h @ w2 + b2


if __name__ == "__main__":
    key = jax.random.PRNGKey(0)
    kx, k1, k2, k3, k4 = jax.random.split(key, 5)

    B, T, C = 2, 8, N_EMBD
    H = HIDDEN

    # Deterministic init mimicking nn.Linear default U[-1/sqrt(fan_in), 1/sqrt(fan_in)].
    # PyTorch stores weight as (out, in); we materialize the transposed (in, out) form.
    bound1 = 1.0 / jnp.sqrt(C)
    bound2 = 1.0 / jnp.sqrt(H)
    w1 = jax.random.uniform(k1, (C, H), jnp.float32, -bound1, bound1)
    b1 = jax.random.uniform(k2, (H,), jnp.float32, -bound1, bound1)
    w2 = jax.random.uniform(k3, (H, C), jnp.float32, -bound2, bound2)
    b2 = jax.random.uniform(k4, (C,), jnp.float32, -bound2, bound2)

    x = jax.random.normal(kx, (B, T, C), jnp.float32)

    ref = reference(x, w1, b1, w2, b2)

    # Pack params once (hoisted out of the per-call path), then run the fused kernel.
    params_bf16 = pack_ffn_params(w1, b1, w2, b2, compute_dtype=jnp.bfloat16)
    out = jax.block_until_ready(feed_forward_packed(x, params_bf16))
    assert out.shape == (B, T, C) and out.dtype == x.dtype
    assert jnp.allclose(out, ref, atol=2e-2, rtol=2e-2), "bf16 path mismatch vs reference"

    # Pure-f32 path: verifies the packed/block-diagonal kernel is exactly equivalent.
    params_f32 = pack_ffn_params(w1, b1, w2, b2, compute_dtype=jnp.float32)
    out_f32 = jax.block_until_ready(feed_forward_packed(x, params_f32))
    assert jnp.allclose(out_f32, ref, atol=1e-5, rtol=1e-5), "f32 path mismatch vs reference"

    # bf16 output path (cuts HBM writeback ~2x when the downstream consumer accepts bf16).
    out_bf16 = jax.block_until_ready(
        feed_forward_packed(x, params_bf16, out_dtype=jnp.bfloat16))
    assert out_bf16.dtype == jnp.bfloat16
    assert jnp.allclose(out_bf16.astype(jnp.float32), ref, atol=5e-2, rtol=5e-2), \
        "bf16-output path mismatch vs reference"

    print("KERNEL_OK")
</pallas_src>

<mosaic_0001>
module attributes {stable_mosaic.version = 11 : i64} {
  func.func @ffn_kernel(%arg0: i32, %arg1: memref<16x128xf32, #tpu.memory_space<vmem>>, %arg2: memref<128x512xbf16, #tpu.memory_space<vmem>>, %arg3: memref<1x512xf32, #tpu.memory_space<vmem>>, %arg4: memref<512x128xbf16, #tpu.memory_space<vmem>>, %arg5: memref<1x128xf32, #tpu.memory_space<vmem>>, %arg6: memref<16x128xf32, #tpu.memory_space<vmem>>) attributes {dimension_semantics = [#tpu.dimension_semantics<parallel>], iteration_bounds = array<i64: 1>, scalar_prefetch = 0 : i64, scratch_operands = 0 : i64, tpu.core_type = #tpu.core_type<tc>, window_params = [{transform_indices = @transform_0, window_bounds = array<i64: 16, 128>}, {pipeline_mode = #tpu.pipeline_mode<synchronous>, transform_indices = @transform_1, window_bounds = array<i64: 128, 512>}, {pipeline_mode = #tpu.pipeline_mode<synchronous>, transform_indices = @transform_2, window_bounds = array<i64: 1, 512>}, {pipeline_mode = #tpu.pipeline_mode<synchronous>, transform_indices = @transform_3, window_bounds = array<i64: 512, 128>}, {pipeline_mode = #tpu.pipeline_mode<synchronous>, transform_indices = @transform_4, window_bounds = array<i64: 1, 128>}, {transform_indices = @transform_5, window_bounds = array<i64: 16, 128>}]} {
    %c0 = arith.constant 0 : index
    %c0_0 = arith.constant 0 : index
    %0 = vector.load %arg1[%c0, %c0_0] : memref<16x128xf32, #tpu.memory_space<vmem>>, vector<16x128xf32>
    %1 = arith.truncf %0 : vector<16x128xf32> to vector<16x128xbf16>
    %c0_1 = arith.constant 0 : index
    %c0_2 = arith.constant 0 : index
    %2 = vector.load %arg2[%c0_1, %c0_2] : memref<128x512xbf16, #tpu.memory_space<vmem>>, vector<128x512xbf16>
    %cst = arith.constant dense<0.000000e+00> : vector<16x512xf32>
    %3 = tpu.matmul %1, %2, %cst {dimension_numbers = #tpu.dot_dimension_numbers<[1], [0], [0], [1], [0, 0, 1, 1], [], []>} : vector<16x128xbf16>, vector<128x512xbf16>, vector<16x512xf32> -> vector<16x512xf32>
    %c0_3 = arith.constant 0 : index
    %c0_4 = arith.constant 0 : index
    %4 = vector.load %arg3[%c0_3, %c0_4] : memref<1x512xf32, #tpu.memory_space<vmem>>, vector<1x512xf32>
    %5 = vector.broadcast %4 : vector<1x512xf32> to vector<16x512xf32>
    %6 = arith.addf %3, %5 : vector<16x512xf32>
    %cst_5 = arith.constant 0.000000e+00 : f32
    %7 = vector.broadcast %cst_5 : f32 to vector<16x512xf32>
    %8 = arith.maximumf %6, %7 : vector<16x512xf32>
    %9 = arith.truncf %8 : vector<16x512xf32> to vector<16x512xbf16>
    %c0_6 = arith.constant 0 : index
    %c0_7 = arith.constant 0 : index
    %10 = vector.load %arg4[%c0_6, %c0_7] : memref<512x128xbf16, #tpu.memory_space<vmem>>, vector<512x128xbf16>
    %cst_8 = arith.constant dense<0.000000e+00> : vector<16x128xf32>
    %11 = tpu.matmul %9, %10, %cst_8 {dimension_numbers = #tpu.dot_dimension_numbers<[1], [0], [0], [1], [0, 0, 1, 1], [], []>} : vector<16x512xbf16>, vector<512x128xbf16>, vector<16x128xf32> -> vector<16x128xf32>
    %c0_9 = arith.constant 0 : index
    %c0_10 = arith.constant 0 : index
    %12 = vector.load %arg5[%c0_9, %c0_10] : memref<1x128xf32, #tpu.memory_space<vmem>>, vector<1x128xf32>
    %13 = vector.broadcast %12 : vector<1x128xf32> to vector<16x128xf32>
    %14 = arith.addf %11, %13 : vector<16x128xf32>
    %c0_11 = arith.constant 0 : index
    %c0_12 = arith.constant 0 : index
    %15 = vector.load %arg6[%c0_11, %c0_12] : memref<16x128xf32, #tpu.memory_space<vmem>>, vector<16x128xf32>
    tpu.vector_store %arg6[%c0_11, %c0_12], %14 {strides = array<i32>} : memref<16x128xf32, #tpu.memory_space<vmem>>, vector<16x128xf32>,
    return
  }
  func.func @transform_0(%arg0: i32) -> (i32, i32) {
    %c0_i32 = arith.constant 0 : i32
    %c0_i32_0 = arith.constant 0 : i32
    return %arg0, %c0_i32 : i32, i32
  }
  func.func @transform_1(%arg0: i32) -> (i32, i32) {
    %c0_i32 = arith.constant 0 : i32
    %c0_i32_0 = arith.constant 0 : i32
    %c0_i32_1 = arith.constant 0 : i32
    return %c0_i32, %c0_i32_0 : i32, i32
  }
  func.func @transform_2(%arg0: i32) -> (i32, i32) {
    %c0_i32 = arith.constant 0 : i32
    %c0_i32_0 = arith.constant 0 : i32
    %c0_i32_1 = arith.constant 0 : i32
    return %c0_i32, %c0_i32_0 : i32, i32
  }
  func.func @transform_3(%arg0: i32) -> (i32, i32) {
    %c0_i32 = arith.constant 0 : i32
    %c0_i32_0 = arith.constant 0 : i32
    %c0_i32_1 = arith.constant 0 : i32
    return %c0_i32, %c0_i32_0 : i32, i32
  }
  func.func @transform_4(%arg0: i32) -> (i32, i32) {
    %c0_i32 = arith.constant 0 : i32
    %c0_i32_0 = arith.constant 0 : i32
    %c0_i32_1 = arith.constant 0 : i32
    return %c0_i32, %c0_i32_0 : i32, i32
  }
  func.func @transform_5(%arg0: i32) -> (i32, i32) {
    %c0_i32 = arith.constant 0 : i32
    %c0_i32_0 = arith.constant 0 : i32
    return %arg0, %c0_i32 : i32, i32
  }
}

</mosaic_0001>

<bundles_post_ra>
// kernel: tpu_custom_call.1
= control target key start
LH: loop header
LB: loop body
LE: loop exit
PB: predicated region body
PF: predicated region fallthrough
CT: control target
= control target key end

     0   :  { %10 = vsyncpa [#allocation3], 0  ;;  %s1219_s0 = inlined_call_operand.hbm [shape: f32[16,128], index: 0, kind: input, shape index: {}]   ;;  %s1220_s1 = inlined_call_operand.hbm [shape: bf16[128,512], index: 1, kind: input, shape index: {}]   ;;  %s1221_s2 = inlined_call_operand.hbm [shape: f32[1,512], index: 2, kind: input, shape index: {}]   ;;  %s1222_s3 = inlined_call_operand.hbm [shape: bf16[512,128], index: 3, kind: input, shape index: {}]   ;;  %s1223_s4 = inlined_call_operand.vmem [shape: f32[1,128], index: 4, kind: input, shape index: {}]   ;;  %s1224_s5 = inlined_call_operand.hbm [shape: f32[16,128], index: 5, kind: output, shape index: {}]  }
   0x1   :  { %11 = vsyncpa [#allocation6], 0 }
   0x2   :  { %12 = vsyncpa [#allocation9], 0  ;;  %s31_s20 = sshll.u32 %s1220_s1, 4  ;;  %s32_s20 = int_to_ptr.hbm [resolvable:$true] %s31_s20 }
   0x3   :  { %13 = vsyncpa [#allocation4], 0  ;;  %s1154_s21 = smov [#allocation5]   ;;  %s18_s25 = sshll.u32 %s1219_s0, 4  ;;  %s19_s25 = int_to_ptr.hbm [resolvable:$true] %s18_s25 }
   0x4   :  { %s33_s22 = sshll.u32 %s1154_s21, 4  ;;  %s1155_s26 = smov 256   ;;  %s34_s22 = int_to_ptr.vmem [resolvable:$true] %s33_s22 }
   0x5   :  { %s1156_s27 = smov 16   ;;  %s1157_s28 = smov [#allocation2]  }
   0x6   :  { %39 = dma.hbm_to_vmem [thread:$0]  %s32_s20, 4096, %s34_s22, [#allocation6], %s1155_s26, %s1155_s26, %s1156_s27  }
   0x7   :  { %s20_s29 = sshll.u32 %s1157_s28, 4  ;;  %s1158_s30 = smov 128   ;;  %s21_s29 = int_to_ptr.vmem [resolvable:$true] %s20_s29 }
   0x8   :  { %s1159_s6 = smov 8   ;;  %s45_s8 = sshll.u32 %s1221_s2, 4  ;;  %s46_s8 = int_to_ptr.hbm [resolvable:$true] %s45_s8 }
   0x9   :  { %26 = dma.hbm_to_vmem [thread:$0]  %s19_s25, 256, %s21_s29, [#allocation3], %s1158_s30, %s1158_s30, %s1159_s6  }
   0xa   :  { %s1160_s9 = smov [#allocation7]   ;;  %s55_s12 = sshll.u32 %s1222_s3, 4  ;;  %s56_s12 = int_to_ptr.hbm [resolvable:$true] %s55_s12 }
   0xb   :  { %s47_s0 = sshll.u32 %s1160_s9, 4  ;;  %s1161_s13 = smov [#allocation8]   ;;  %s48_s0 = int_to_ptr.vmem [resolvable:$true] %s47_s0 }
   0xc   :  { %50 = dma.hbm_to_vmem [thread:$0]  %s46_s8, 64, %s48_s0, [#allocation6]  }
   0xd   :  { %s57_s14 = sshll.u32 %s1161_s13, 4  ;;  %s1162_s15 = smov 64   ;;  %s58_s14 = int_to_ptr.vmem [resolvable:$true] %s57_s14 }
   0xe   :  { %s1163_s16 = smov 4  }
   0xf   :  { %63 = dma.hbm_to_vmem [thread:$0]  %s56_s12, 4096, %s58_s14, [#allocation9], %s1162_s15, %s1162_s15, %s1163_s16  }
  0x10   :  { %1146 = dma.done.wait [#allocation3], 256  }
  0x11   :  { %1147 = vsyncadd [#allocation3], 4294967040 }
  0x12   :  { %1148 = dma.done.wait [#allocation6], 4160  }
  0x13   :  { %1149 = vsyncadd [#allocation6], 4294963136 }
  0x14   :  { %1150 = dma.done.wait [#allocation9], 4096  }
  0x15   :  { %1151 = vsyncadd [#allocation9], 4294963200  ;;  %v808_v0 = vld [vmem:[#allocation5 + $0xe0] sm:$0xf]  ;;  %v980_v1 = vld [vmem:[#allocation5 + $0xec] sm:$0xf0] }
  0x16   :  { %v978_v2 = vld [vmem:[#allocation5 + $0xe4] sm:$0xf]  ;;  %v809_v3 = vor.u32 %v980_v1, %v808_v0  ;;  %v810_v4 = vld [vmem:[#allocation5 + $0xf0] sm:$0xf0]  ;;  %v816_v5 = vld [vmem:[#allocation5 + $0xe8] sm:$0xf] }
  0x17   :  { %v981_v6 = vld [vmem:[#allocation5 + $0xf4] sm:$0xf0]  ;;  %v813_v7 = vor.u32 %v978_v2, %v810_v4  ;;  %v979_v9 = vld [vmem:[#allocation5 + $0xec] sm:$0xf]  ;;  %v818_v10 = vld [vmem:[#allocation5 + $0xf8] sm:$0xf0] }
  0x18   :  { %v817_v8 = vor.u32 %v981_v6, %v816_v5  ;;  %v792_v11 = vld [vmem:[#allocation5 + $0xc0] sm:$0xf]  ;;  %287 = vmatpush.bf16.msra.mxu0 %v809_v3  ;;  %v821_v12 = vor.u32 %v979_v9, %v818_v10  ;;  %v976_v13 = vld [vmem:[#allocation5 + $0xcc] sm:$0xf0]  ;;  %v974_v14 = vld [vmem:[#allocation5 + $0xc4] sm:$0xf] }
  0x19   :  { %v794_v15 = vld [vmem:[#allocation5 + $0xd0] sm:$0xf0]  ;;  %301 = vmatpush.bf16.msra.mxu1 %v813_v7  ;;  %v793_v16 = vor.u32 %v976_v13, %v792_v11  ;;  %v800_v18 = vld [vmem:[#allocation5 + $0xc8] sm:$0xf]  ;;  %v977_v19 = vld [vmem:[#allocation5 + $0xd4] sm:$0xf0] }
  0x1a   :  { %315 = vmatpush.bf16.msra.mxu2 %v817_v8  ;;  %v797_v17 = vor.u32 %v974_v14, %v794_v15  ;;  %v975_v20 = vld [vmem:[#allocation5 + $0xcc] sm:$0xf]  ;;  %329 = vmatpush.bf16.msra.mxu3 %v821_v12  ;;  %v801_v21 = vor.u32 %v977_v19, %v800_v18  ;;  %v802_v22 = vld [vmem:[#allocation5 + $0xd8] sm:$0xf0]  ;;  %v776_v23 = vld [vmem:[#allocation5 + $0xa0] sm:$0xf] }
  0x1b   :  { %v972_v24 = vld [vmem:[#allocation5 + $0xac] sm:$0xf0]  ;;  %v805_v25 = vor.u32 %v975_v20, %v802_v22  ;;  %v970_v26 = vld [vmem:[#allocation5 + $0xa4] sm:$0xf]  ;;  %v778_v27 = vld [vmem:[#allocation5 + $0xb0] sm:$0xf0] }
  0x1c   :  { %v784_v28 = vld [vmem:[#allocation5 + $0xa8] sm:$0xf]  ;;  %288 = vmatpush.bf16.msra.mxu0 %v793_v16  ;;  %v777_v29 = vor.u32 %v972_v24, %v776_v23  ;;  %v973_v30 = vld [vmem:[#allocation5 + $0xb4] sm:$0xf0]  ;;  %v971_v31 = vld [vmem:[#allocation5 + $0xac] sm:$0xf]  ;;  %v781_v33 = vor.u32 %v970_v26, %v778_v27 }
  0x1d   :  { %v786_v32 = vld [vmem:[#allocation5 + $0xb8] sm:$0xf0]  ;;  %302 = vmatpush.bf16.msra.mxu1 %v797_v17  ;;  %v785_v34 = vor.u32 %v973_v30, %v784_v28  ;;  %v760_v35 = vld [vmem:[#allocation5 + $0x80] sm:$0xf]  ;;  %v968_v36 = vld [vmem:[#allocation5 + $0x8c] sm:$0xf0] }
  0x1e   :  { %316 = vmatpush.bf16.msra.mxu2 %v801_v21  ;;  %v966_v37 = vld [vmem:[#allocation5 + $0x84] sm:$0xf]  ;;  %330 = vmatpush.bf16.msra.mxu3 %v805_v25  ;;  %v789_v38 = vor.u32 %v971_v31, %v786_v32  ;;  %v762_v39 = vld [vmem:[#allocation5 + $0x90] sm:$0xf0]  ;;  %v768_v40 = vld [vmem:[#allocation5 + $0x88] sm:$0xf]  ;;  %v761_v44 = vor.u32 %v968_v36, %v760_v35 }
  0x1f   :  { %v969_v41 = vld [vmem:[#allocation5 + $0x94] sm:$0xf0]  ;;  %v967_v42 = vld [vmem:[#allocation5 + $0x8c] sm:$0xf]  ;;  %v770_v43 = vld [vmem:[#allocation5 + $0x98] sm:$0xf0]  ;;  %v765_v45 = vor.u32 %v966_v37, %v762_v39 }
  0x20   :  { %289 = vmatpush.bf16.msra.mxu0 %v777_v29  ;;  %v769_v46 = vor.u32 %v969_v41, %v768_v40  ;;  %v744_v47 = vld [vmem:[#allocation5 + $0x60] sm:$0xf]  ;;  %v964_v48 = vld [vmem:[#allocation5 + $0x6c] sm:$0xf0]  ;;  %v962_v49 = vld [vmem:[#allocation5 + $0x64] sm:$0xf]  ;;  %v773_v50 = vor.u32 %v967_v42, %v770_v43 }
  0x21   :  { %303 = vmatpush.bf16.msra.mxu1 %v781_v33  ;;  %v746_v51 = vld [vmem:[#allocation5 + $0x70] sm:$0xf0]  ;;  %v752_v52 = vld [vmem:[#allocation5 + $0x68] sm:$0xf]  ;;  %v965_v53 = vld [vmem:[#allocation5 + $0x74] sm:$0xf0]  ;;  %v745_v56 = vor.u32 %v964_v48, %v744_v47 }
  0x22   :  { %317 = vmatpush.bf16.msra.mxu2 %v785_v34  ;;  %331 = vmatpush.bf16.msra.mxu3 %v789_v38  ;;  %v963_v54 = vld [vmem:[#allocation5 + $0x6c] sm:$0xf]  ;;  %v754_v55 = vld [vmem:[#allocation5 + $0x78] sm:$0xf0]  ;;  %v749_v57 = vor.u32 %v962_v49, %v746_v51  ;;  %v753_v58 = vor.u32 %v965_v53, %v752_v52  ;;  %v728_v59 = vld [vmem:[#allocation5 + $0x40] sm:$0xf] }
  0x23   :  { %v960_v60 = vld [vmem:[#allocation5 + $0x4c] sm:$0xf0]  ;;  %v958_v61 = vld [vmem:[#allocation5 + $0x44] sm:$0xf]  ;;  %v757_v62 = vor.u32 %v963_v54, %v754_v55  ;;  %v730_v63 = vld [vmem:[#allocation5 + $0x50] sm:$0xf0] }
  0x24   :  { %290 = vmatpush.bf16.msra.mxu0 %v761_v44  ;;  %v736_v0 = vld [vmem:[#allocation5 + $0x48] sm:$0xf]  ;;  %v961_v1 = vld [vmem:[#allocation5 + $0x54] sm:$0xf0]  ;;  %v959_v2 = vld [vmem:[#allocation5 + $0x4c] sm:$0xf]  ;;  %v729_v4 = vor.u32 %v960_v60, %v728_v59  ;;  %v733_v5 = vor.u32 %v958_v61, %v730_v63 }
  0x25   :  { %304 = vmatpush.bf16.msra.mxu1 %v765_v45  ;;  %v738_v3 = vld [vmem:[#allocation5 + $0x58] sm:$0xf0]  ;;  %v737_v6 = vor.u32 %v961_v1, %v736_v0  ;;  %v712_v7 = vld [vmem:[#allocation5 + $0x20] sm:$0xf]  ;;  %v956_v8 = vld [vmem:[#allocation5 + $0x2c] sm:$0xf0] }
  0x26   :  { %318 = vmatpush.bf16.msra.mxu2 %v769_v46  ;;  %332 = vmatpush.bf16.msra.mxu3 %v773_v50  ;;  %v954_v9 = vld [vmem:[#allocation5 + $0x24] sm:$0xf]  ;;  %v741_v10 = vor.u32 %v959_v2, %v738_v3  ;;  %v714_v11 = vld [vmem:[#allocation5 + $0x30] sm:$0xf0]  ;;  %v720_v12 = vld [vmem:[#allocation5 + $0x28] sm:$0xf]  ;;  %v713_v16 = vor.u32 %v956_v8, %v712_v7 }
  0x27   :  { %v957_v13 = vld [vmem:[#allocation5 + $0x34] sm:$0xf0]  ;;  %v955_v14 = vld [vmem:[#allocation5 + $0x2c] sm:$0xf]  ;;  %v722_v15 = vld [vmem:[#allocation5 + $0x38] sm:$0xf0]  ;;  %v717_v17 = vor.u32 %v954_v9, %v714_v11 }
  0x28   :  { %291 = vmatpush.bf16.msra.mxu0 %v745_v56  ;;  %v721_v18 = vor.u32 %v957_v13, %v720_v12  ;;  %v696_v19 = vld [vmem:[#allocation5] sm:$0xf]  ;;  %v952_v20 = vld [vmem:[#allocation5 + $0xc] sm:$0xf0]  ;;  %v950_v21 = vld [vmem:[#allocation5 + $0x4] sm:$0xf]  ;;  %v725_v22 = vor.u32 %v955_v14, %v722_v15 }
  0x29   :  { %305 = vmatpush.bf16.msra.mxu1 %v749_v57  ;;  %v698_v23 = vld [vmem:[#allocation5 + $0x10] sm:$0xf0]  ;;  %v704_v24 = vld [vmem:[#allocation5 + $0x8] sm:$0xf]  ;;  %v953_v25 = vld [vmem:[#allocation5 + $0x14] sm:$0xf0]  ;;  %v697_v28 = vor.u32 %v952_v20, %v696_v19 }
  0x2a   :  { %319 = vmatpush.bf16.msra.mxu2 %v753_v58  ;;  %333 = vmatpush.bf16.msra.mxu3 %v757_v62  ;;  %v951_v26 = vld [vmem:[#allocation5 + $0xc] sm:$0xf]  ;;  %v706_v27 = vld [vmem:[#allocation5 + $0x18] sm:$0xf0]  ;;  %v82_v29 = vld [vmem:[#allocation2] sm:$0xff]  ;;  %v701_v31 = vor.u32 %v950_v21, %v698_v23  ;;  %v705_v32 = vor.u32 %v953_v25, %v704_v24  ;;  %s1164_s17 = smov [#allocation10]  }
  0x2b   :  { %v83_v30 = vld [vmem:[#allocation2 + $0x8] sm:$0xff]  ;;  %v709_v33 = vor.u32 %v951_v26, %v706_v27  ;;  %v987_v42 = vld [vmem:[#allocation8 + $0x28] sm:$0xff]  ;;  %v986_v46 = vld [vmem:[#allocation8 + $0x20] sm:$0xff]  ;;  %s677_s18 = sshll.u32 %s1164_s17, 4  ;;  %s679_s21 = sshll.u32 %s1224_s5, 4  ;;  %s678_s18 = int_to_ptr.vmem [resolvable:$true] %s677_s18  ;;  %s680_s21 = int_to_ptr.hbm [resolvable:$true] %s679_s21 }
  0x2c   :  { %292 = vmatpush.bf16.msra.mxu0 %v729_v4  ;;  %v989_v34 = vld [vmem:[#allocation8 + $0x38] sm:$0xff]  ;;  %v84_v35 = vpack.c.bf16 %v83_v30, %v82_v29  ;;  %v988_v38 = vld [vmem:[#allocation8 + $0x30] sm:$0xff]  ;;  %v995_v44 = vld [vmem:[#allocation8 + $0x68] sm:$0xff] }
  0x2d   :  { %306 = vmatpush.bf16.msra.mxu1 %v733_v5  ;;  %v997_v36 = vld [vmem:[#allocation8 + $0x78] sm:$0xff]  ;;  %v996_v40 = vld [vmem:[#allocation8 + $0x70] sm:$0xff]  ;;  %v1003_v45 = vld [vmem:[#allocation8 + $0xa8] sm:$0xff] }
  0x2e   :  { %320 = vmatpush.bf16.msra.mxu2 %v737_v6  ;;  %334 = vmatpush.bf16.msra.mxu3 %v741_v10  ;;  %v1005_v37 = vld [vmem:[#allocation8 + $0xb8] sm:$0xff]  ;;  %v1004_v41 = vld [vmem:[#allocation8 + $0xb0] sm:$0xff]  ;;  %v1011_v47 = vld [vmem:[#allocation8 + $0xe8] sm:$0xff] }
  0x2f   :  { %v1013_v39 = vld [vmem:[#allocation8 + $0xf8] sm:$0xff]  ;;  %v1012_v43 = vld [vmem:[#allocation8 + $0xf0] sm:$0xff]  ;;  %v994_v48 = vld [vmem:[#allocation8 + $0x60] sm:$0xff] }
  0x30   :  { %293 = vmatpush.bf16.msra.mxu0 %v713_v16  ;;  %v985_v49 = vld [vmem:[#allocation8 + $0x18] sm:$0xff]  ;;  %v1002_v51 = vld [vmem:[#allocation8 + $0xa0] sm:$0xff]  ;;  %v984_v53 = vld [vmem:[#allocation8 + $0x10] sm:$0xff] }
  0x31   :  { %307 = vmatpush.bf16.msra.mxu1 %v717_v17  ;;  %v993_v50 = vld [vmem:[#allocation8 + $0x58] sm:$0xff]  ;;  %v1010_v52 = vld [vmem:[#allocation8 + $0xe0] sm:$0xff]  ;;  %v992_v54 = vld [vmem:[#allocation8 + $0x50] sm:$0xff] }
  0x32   :  { %321 = vmatpush.bf16.msra.mxu2 %v721_v18  ;;  %335 = vmatpush.bf16.msra.mxu3 %v725_v22  ;;  %v1001_v55 = vld [vmem:[#allocation8 + $0x98] sm:$0xff]  ;;  %v983_v57 = vld [vmem:[#allocation8 + $0x8] sm:$0xff]  ;;  %v1000_v59 = vld [vmem:[#allocation8 + $0x90] sm:$0xff] }
  0x33   :  { %v1009_v56 = vld [vmem:[#allocation8 + $0xd8] sm:$0xff]  ;;  %v991_v58 = vld [vmem:[#allocation8 + $0x48] sm:$0xff]  ;;  %v1008_v60 = vld [vmem:[#allocation8 + $0xd0] sm:$0xff] }
  0x34   :  { %294 = vmatpush.bf16.msra.mxu0 %v697_v28  ;;  %v982_v61 = vld [vmem:[#allocation8] sm:$0xff]  ;;  %v999_v63 = vld [vmem:[#allocation8 + $0x88] sm:$0xff]  ;;  %v117_v3 = vld [vmem:[#allocation7] sm:$0xf] }
  0x35   :  { %308 = vmatpush.bf16.msra.mxu1 %v701_v31  ;;  %v990_v62 = vld [vmem:[#allocation8 + $0x40] sm:$0xff]  ;;  %v1007_v0 = vld [vmem:[#allocation8 + $0xc8] sm:$0xff]  ;;  %v119_v5 = vperm.slane %v117_v3, 0  ;;  %v120_v7 = vperm.slane %v117_v3, 1  ;;  %v121_v17 = vperm.slane %v117_v3, 2  ;;  %v122_v19 = vperm.slane %v117_v3, 3 }
  0x36   :  { %322 = vmatpush.bf16.msra.mxu2 %v705_v32  ;;  %336 = vmatpush.bf16.msra.mxu3 %v709_v33  ;;  %v998_v1 = vld [vmem:[#allocation8 + $0x80] sm:$0xff] }
  0x37   :  { %295 = vmatmul.bf16.vlgmr.msra.gmra.mxu0 %v84_v35  ;;  %v1006_v2 = vld [vmem:[#allocation8 + $0xc0] sm:$0xff] }
  0x38   :  { %615 = vmatpush.bf16.msrb.mxu0 %v989_v34  ;;  %309 = vmatmul.bf16.vlgmr.msra.gmra.mxu1 %v84_v35 }
  0x39   :  { %629 = vmatpush.bf16.msrb.mxu1 %v997_v36  ;;  %323 = vmatmul.bf16.vlgmr.msra.gmra.mxu2 %v84_v35 }
  0x3a   :  { %337 = vmatmul.bf16.vlgmr.msra.gmra.mxu3 %v84_v35  ;;  %643 = vmatpush.bf16.msrb.mxu2 %v1005_v37  ;;  %v1025_v37 = vld [vmem:[%s1223_s4] ss:$0 sm:$0xff] }
  0x3b   :  { %657 = vmatpush.bf16.msrb.mxu3 %v1013_v39 }
  0x3c   :  { %616 = vmatpush.bf16.msrb.mxu0 %v988_v38 }
  0x3d   :  { %630 = vmatpush.bf16.msrb.mxu1 %v996_v40 }
  0x3e   :  { %644 = vmatpush.bf16.msrb.mxu2 %v1004_v41 }
  0x3f   :  { %658 = vmatpush.bf16.msrb.mxu3 %v1012_v43 }
  0x40   :  { %617 = vmatpush.bf16.msrb.mxu0 %v987_v42 }
  0x41   :  { %631 = vmatpush.bf16.msrb.mxu1 %v995_v44 }
  0x42   :  { %645 = vmatpush.bf16.msrb.mxu2 %v1003_v45 }
  0x43   :  { %659 = vmatpush.bf16.msrb.mxu3 %v1011_v47 }
  0x44   :  { %618 = vmatpush.bf16.msrb.mxu0 %v986_v46 }
  0x45   :  { %632 = vmatpush.bf16.msrb.mxu1 %v994_v48 }
  0x46   :  { %646 = vmatpush.bf16.msrb.mxu2 %v1002_v51 }
  0x47   :  { %660 = vmatpush.bf16.msrb.mxu3 %v1010_v52 }
  0x48   :  { %619 = vmatpush.bf16.msrb.mxu0 %v985_v49 }
  0x49   :  { %633 = vmatpush.bf16.msrb.mxu1 %v993_v50 }
  0x4a   :  { %647 = vmatpush.bf16.msrb.mxu2 %v1001_v55 }
  0x4b   :  { %661 = vmatpush.bf16.msrb.mxu3 %v1009_v56 }
  0x4c   :  { %620 = vmatpush.bf16.msrb.mxu0 %v984_v53 }
  0x4d   :  { %634 = vmatpush.bf16.msrb.mxu1 %v992_v54 }
  0x4e   :  { %648 = vmatpush.bf16.msrb.mxu2 %v1000_v59 }
  0x4f   :  { %662 = vmatpush.bf16.msrb.mxu3 %v1008_v60 }
  0x50   :  { %621 = vmatpush.bf16.msrb.mxu0 %v983_v57 }
  0x51   :  { %635 = vmatpush.bf16.msrb.mxu1 %v991_v58 }
  0x52   :  { %649 = vmatpush.bf16.msrb.mxu2 %v999_v63 }
  0x53   :  { %663 = vmatpush.bf16.msrb.mxu3 %v1007_v0 }
  0x54   :  { %622 = vmatpush.bf16.msrb.mxu0 %v982_v61 }
  0x55   :  { %636 = vmatpush.bf16.msrb.mxu1 %v990_v62 }
  0x56   :  { %650 = vmatpush.bf16.msrb.mxu2 %v998_v1 }
  0x57   :  { %664 = vmatpush.bf16.msrb.mxu3 %v1006_v2 }
  0xb4   :  { %v296_v4 = vpop.f32.mrf.mxu0 }
  0xb5   :  { %v310_v6 = vpop.f32.mrf.mxu1  ;;  %v297_v8 = vadd.f32 %v296_v4, %v119_v5 }
  0xb6   :  { %v311_v9 = vadd.f32 %v310_v6, %v120_v7 }
  0xb7   :  { %v343_v13 = vmax.f32 %v297_v8, 0.0 }
  0xb8   :  { %v344_v16 = vmax.f32 %v311_v9, 0.0 }
  0xbc   :  { %v324_v10 = vpop.f32.mrf.mxu2  ;;  %v298_v12 = vpop.f32.mrf.mxu0 }
  0xbd   :  { %v338_v11 = vpop.f32.mrf.mxu3  ;;  %v299_v14 = vadd.f32 %v298_v12, %v119_v5  ;;  %v312_v15 = vpop.f32.mrf.mxu1  ;;  %v325_v23 = vadd.f32 %v324_v10, %v121_v17 }
  0xbe   :  { %v313_v18 = vadd.f32 %v312_v15, %v120_v7  ;;  %v339_v25 = vadd.f32 %v338_v11, %v122_v19 }
  0xbf   :  { %v347_v20 = vmax.f32 %v299_v14, 0.0  ;;  %v345_v30 = vmax.f32 %v325_v23, 0.0 }
  0xc0   :  { %v348_v21 = vmax.f32 %v313_v18, 0.0  ;;  %v346_v32 = vmax.f32 %v339_v25, 0.0 }
  0xc1   :  { %v351_v22 = vpack.c.bf16 %v347_v20, %v343_v13 }
  0xc2   :  { %v352_v24 = vpack.c.bf16 %v348_v21, %v344_v16 }
  0xc3   :  { %623 = vmatmul.bf16.vlgmr.msrb.gmra.mxu0 %v351_v22 }
  0xc4   :  { %v326_v26 = vpop.f32.mrf.mxu2  ;;  %637 = vmatmul.bf16.vlgmr.msrb.gmra.mxu1 %v352_v24 }
  0xc5   :  { %v327_v27 = vadd.f32 %v326_v26, %v121_v17  ;;  %v340_v28 = vpop.f32.mrf.mxu3 }
  0xc6   :  { %v341_v29 = vadd.f32 %v340_v28, %v122_v19 }
  0xc7   :  { %v349_v31 = vmax.f32 %v327_v27, 0.0 }
  0xc8   :  { %v350_v33 = vmax.f32 %v341_v29, 0.0 }
  0xc9   :  { %v353_v34 = vpack.c.bf16 %v349_v31, %v345_v30 }
  0xca   :  { %v354_v35 = vpack.c.bf16 %v350_v33, %v346_v32 }
  0xcb   :  { %651 = vmatmul.bf16.vlgmr.msrb.gmra.mxu2 %v353_v34 }
  0xcc   :  { %665 = vmatmul.bf16.vlgmr.msrb.gmra.mxu3 %v354_v35 }
 0x140   :  { %v624_v36 = vpop.f32.mrf.mxu0 }
 0x141   :  { %v625_v38 = vadd.f32 %v1025_v37, %v624_v36  ;;  %v638_v39 = vpop.f32.mrf.mxu1 }
 0x143   :  { %v639_v40 = vadd.f32 %v638_v39, %v625_v38 }
 0x148   :  { %v626_v41 = vpop.f32.mrf.mxu0 }
 0x149   :  { %v627_v45 = vadd.f32 %v1025_v37, %v626_v41  ;;  %v640_v47 = vpop.f32.mrf.mxu1 }
 0x14b   :  { %v641_v48 = vadd.f32 %v640_v47, %v627_v45 }
 0x14e   :  { %v652_v42 = vpop.f32.mrf.mxu2 }
 0x14f   :  { %v653_v43 = vadd.f32 %v652_v42, %v639_v40  ;;  %v666_v44 = vpop.f32.mrf.mxu3 }
 0x151   :  { %v667_v46 = vadd.f32 %v666_v44, %v653_v43 }
 0x153   :  { %671 = vst [vmem:[#allocation10] sm:$0xff] %v667_v46 }
 0x156   :  { %v654_v49 = vpop.f32.mrf.mxu2 }
 0x157   :  { %v655_v50 = vadd.f32 %v654_v49, %v641_v48  ;;  %v668_v51 = vpop.f32.mrf.mxu3 }
 0x159   :  { %v669_v52 = vadd.f32 %v668_v51, %v655_v50 }
 0x15b   :  { %672 = vst [vmem:[#allocation10 + $0x8] sm:$0xff] %v669_v52 }
 0x15c   :  { %685 = dma.vmem_to_hbm [thread:$0]  %s678_s18, 256, %s680_s21, [#allocation4], %s1158_s30, %s1158_s30, %s1159_s6  }
 0x15d   :  { %1152 = dma.done.wait [#allocation4], 256  }
 0x15e   :  { %1153 = vsyncadd [#allocation4], 4294967040 }
 0x15f   :  { %690 = vsyncpa [#allocation3], 1 }
 0x160   :  { %691 = vsyncpa [#allocation6], 1 }
 0x161   :  { %692 = vsyncpa [#allocation9], 1 }
 0x162   :  { %693 = vsyncpa [#allocation4], 1 }

</bundles_post_ra>
